<compile_context>
chip_gen: v5e
topology: v5e:2x2
jax: 0.10.0
libtpu: 0.0.40
codegen_flags: <defaults>
</compile_context>

<pallas_src>
import functools

import jax
import jax.numpy as jnp
from jax import lax
from jax.experimental import pallas as pl
from jax.experimental.pallas import tpu as pltpu


SMOOTH = 1.0


def _round_up(v, m):
    return ((v + m - 1) // m) * m


def _vmem_budget_bytes():
    """~75% of physical VMEM; v7x-safe 48 MiB fallback if the query fails."""
    cap = None
    try:
        cap = pltpu.get_tpu_info().vmem_capacity_bytes
    except Exception:
        cap = None
    if not cap:
        cap = 64 * 1024 * 1024          # conservative (v7x physical)
    return min(int(cap) * 3 // 4, 96 * 1024 * 1024)


def _dice_sums_kernel(x_ref, y_ref, inter_ref, denom_ref, *,
                      s, ts, tr, tr_out, split_blocks, need_mask):
    # Grid axes: (core split [parallel], row blocks [parallel],
    #             spatial blocks [arbitrary / reduction, innermost]).
    c = pl.program_id(0)
    k = pl.program_id(2)

    @pl.when(k == 0)
    def _():
        inter_ref[...] = jnp.zeros_like(inter_ref)
        denom_ref[...] = jnp.zeros_like(denom_ref)

    def accumulate(x, y):
        i_sum = jnp.sum(x * y, axis=1, keepdims=True)
        d_sum = (jnp.sum(x * x, axis=1, keepdims=True)
                 + jnp.sum(y * y, axis=1, keepdims=True))
        if tr == tr_out:
            inter_ref[...] += i_sum
            denom_ref[...] += d_sum
        else:
            # Output block is padded to a legal 8-row multiple; only the
            # first tr rows carry real data (pad rows stay zero, dropped in
            # the epilogue).
            inter_ref[0:tr, :] += i_sum
            denom_ref[0:tr, :] += d_sum

    if need_mask:
        # Global spatial block index for this (split, step); blocks past the
        # end of the array (overflow of the core split) or the partial last
        # tile are handled by the masked edge path only.
        g = c * split_blocks + k
        col0 = g * ts
        is_edge = (col0 + ts) > s

        @pl.when(jnp.logical_not(is_edge))
        def _():
            accumulate(x_ref[...].astype(jnp.float32),
                       y_ref[...].astype(jnp.float32))

        @pl.when(is_edge)
        def _():
            x = x_ref[...].astype(jnp.float32)
            y = y_ref[...].astype(jnp.float32)
            col = lax.broadcasted_iota(jnp.int32, x.shape, 1) + col0
            valid = col < s
            accumulate(jnp.where(valid, x, 0.0), jnp.where(valid, y, 0.0))
    else:
        accumulate(x_ref[...].astype(jnp.float32),
                   y_ref[...].astype(jnp.float32))


def naive_dice(net_output, y_onehot, *, smooth=SMOOTH, block_bytes=None):
    """net_output, y_onehot: (N, C, *spatial) arrays. Returns scalar f32 loss."""
    assert net_output.shape == y_onehot.shape
    n, ch = net_output.shape[0], net_output.shape[1]
    r = n * ch
    s = 1
    for d in net_output.shape[2:]:
        s *= d

    # Free metadata reshapes -- no HBM copies, no padding, native dtype.
    x2d = net_output.reshape(r, s)
    y2d = y_onehot.reshape(r, s)
    itemsize = jnp.dtype(net_output.dtype).itemsize

    # --- Tile selection ------------------------------------------------------
    # Sublane packing per dtype: f32 -> 8 rows, bf16 -> 16, int8/fp8 -> 32.
    pack = 8 * max(1, 4 // itemsize)
    sp = _round_up(s, 128)
    # Size blocks from the f32 working set (inputs are cast to f32 in-kernel).
    eff = max(itemsize, 4)

    vmem_limit = _vmem_budget_bytes()
    if block_bytes is not None:
        target_block_bytes = int(block_bytes)          # test hook
    else:
        # Keep >= 4 MiB per input block even on the conservative fallback
        # budget so HBM DMAs stay long and contiguous (v5e roofline).
        target_block_bytes = max(4 * 1024 * 1024, vmem_limit // 12)

    tr_min = r if r <= pack else pack

    if tr_min * sp * eff <= target_block_bytes:
        # Whole spatial row fits: single reduction step, fully contiguous
        # HBM slabs.  Split rows ~in half (packing-aligned) so the parallel
        # axis still has >= 2 entries for v7x megacore when r allows it.
        ts = sp
        if r <= pack:
            tr = r
        else:
            tr_cap = max(pack,
                         (target_block_bytes // (sp * eff)) // pack * pack)
            tr_half = _round_up(pl.cdiv(r, 2), pack)
            tr = min(tr_half, tr_cap)
    else:
        # Spatial dimension must be tiled: keep rows minimal (longest
        # contiguous per-row DMA chunks), lane-dense multiple of 128.
        tr = tr_min
        ts = (target_block_bytes // (tr * eff)) // 128 * 128
        ts = max(128, min(ts, sp))

    row_blocks = pl.cdiv(r, tr)
    s_blocks = pl.cdiv(s, ts)

    # v7x megacore: if there is only one row block but several spatial
    # blocks, split the spatial reduction across 2 cores, each with its own
    # partial accumulators (summed in the epilogue).
    n_split = 2 if (row_blocks == 1 and s_blocks >= 2) else 1
    split_blocks = pl.cdiv(s_blocks, n_split)

    total_out_blocks = n_split * row_blocks
    # Output blocks must have an 8-divisible (or full-extent) sublane dim.
    if total_out_blocks > 1 and tr % 8 != 0:
        tr_out = _round_up(tr, 8)
    else:
        tr_out = tr
    out_rows = total_out_blocks * tr_out

    need_mask = (s % ts != 0) or (n_split * split_blocks != s_blocks)

    grid = (n_split, row_blocks, split_blocks)

    def in_index_map(c, i, k):
        g = c * split_blocks + k
        # Clamp overflow blocks of the core split; their lanes are fully
        # masked in-kernel so the (duplicated) data contributes zero.
        return (i, jnp.minimum(g, s_blocks - 1))

    def out_index_map(c, i, k):
        return (c * row_blocks + i, 0)

    kernel = functools.partial(_dice_sums_kernel, s=s, ts=ts, tr=tr,
                               tr_out=tr_out, split_blocks=split_blocks,
                               need_mask=need_mask)

    cost = pl.CostEstimate(
        flops=6 * r * s,
        transcendentals=0,
        bytes_accessed=2 * r * s * itemsize + 2 * out_rows * 4,
    )

    inter, denom = pl.pallas_call(
        kernel,
        out_shape=(jax.ShapeDtypeStruct((out_rows, 1), jnp.float32),
                   jax.ShapeDtypeStruct((out_rows, 1), jnp.float32)),
        grid_spec=pltpu.PrefetchScalarGridSpec(
            num_scalar_prefetch=0,
            grid=grid,
            in_specs=[pl.BlockSpec((tr, ts), in_index_map),
                      pl.BlockSpec((tr, ts), in_index_map)],
            out_specs=[pl.BlockSpec((tr_out, 1), out_index_map),
                       pl.BlockSpec((tr_out, 1), out_index_map)],
        ),
        compiler_params=pltpu.CompilerParams(
            dimension_semantics=("parallel", "parallel", "arbitrary"),
            vmem_limit_bytes=vmem_limit),
        cost_estimate=cost,
    )(x2d, y2d)

    # Tiny epilogue in plain JAX (fp32): drop pad rows, sum core-split
    # partials, apply smooth / 2x / mean / negate.
    def _collapse(a):
        a = a[:, 0].reshape(n_split, row_blocks, tr_out)[:, :, :tr]
        a = a.reshape(n_split, row_blocks * tr)[:, :r]
        return jnp.sum(a, axis=0)

    inter = _collapse(inter) + smooth
    denom = _collapse(denom) + smooth
    dc = 2.0 * inter / denom
    return -jnp.mean(dc)


if __name__ == "__main__":
    key = jax.random.PRNGKey(0)
    k1, k2 = jax.random.split(key)

    def ref_loss(x, y):
        axes = tuple(range(2, x.ndim))
        xf = x.astype(jnp.float32)
        yf = y.astype(jnp.float32)
        ri = jnp.sum(xf * yf, axis=axes) + SMOOTH
        rd = jnp.sum(xf * xf + yf * yf, axis=axes) + SMOOTH
        return -jnp.mean(2.0 * ri / rd)

    # Test 1: default path (NCHW, f32): batch=2, channels=4, spatial 16x16.
    x = jax.nn.softmax(jax.random.normal(k1, (2, 4, 16, 16), jnp.float32),
                       axis=1)
    labels = jax.random.randint(k2, (2, 16, 16), 0, 4)
    y = jax.nn.one_hot(labels, 4, dtype=jnp.float32).transpose(0, 3, 1, 2)
    loss = jax.block_until_ready(naive_dice(x, y))
    assert jnp.allclose(loss, ref_loss(x, y), rtol=1e-6, atol=1e-6), loss

    # Test 2: bf16 inputs (native-dtype streaming / bf16 sublane packing).
    xb = x.astype(jnp.bfloat16)
    yb = y.astype(jnp.bfloat16)
    loss_bf16 = jax.block_until_ready(naive_dice(xb, yb))
    assert jnp.allclose(loss_bf16, ref_loss(xb, yb),
                        rtol=1e-4, atol=1e-4), loss_bf16

    # Test 3: force tiny blocks to exercise the core-split, gated edge
    # masking, overflow-block clamping and padded-accumulator paths
    # (r=2 rows, s=700 spatial -> grid (2, 1, 2)).
    k3, k4 = jax.random.split(k1)
    x3 = jax.nn.sigmoid(jax.random.normal(k3, (1, 2, 7, 100), jnp.float32))
    y3 = (jax.random.uniform(k4, (1, 2, 7, 100)) > 0.5).astype(jnp.float32)
    loss3 = jax.block_until_ready(naive_dice(x3, y3, block_bytes=2048))
    assert jnp.allclose(loss3, ref_loss(x3, y3), rtol=1e-5, atol=1e-6), loss3

    print("KERNEL_OK")
</pallas_src>

<mosaic_0001>
module attributes {stable_mosaic.version = 11 : i64} {
  func.func @_dice_sums_kernel(%arg0: i32, %arg1: i32, %arg2: i32, %arg3: memref<8x256xf32, #tpu.memory_space<vmem>>, %arg4: memref<8x256xf32, #tpu.memory_space<vmem>>, %arg5: memref<8x1xf32, #tpu.memory_space<vmem>>, %arg6: memref<8x1xf32, #tpu.memory_space<vmem>>) attributes {dimension_semantics = [#tpu.dimension_semantics<parallel>, #tpu.dimension_semantics<parallel>, #tpu.dimension_semantics<arbitrary>], iteration_bounds = array<i64: 1, 1, 1>, scalar_prefetch = 0 : i64, scratch_operands = 0 : i64, tpu.core_type = #tpu.core_type<tc>, window_params = [{transform_indices = @transform_0, window_bounds = array<i64: 8, 256>}, {transform_indices = @transform_1, window_bounds = array<i64: 8, 256>}, {transform_indices = @transform_2, window_bounds = array<i64: 8, 1>}, {transform_indices = @transform_3, window_bounds = array<i64: 8, 1>}]} {
    %c0_i32 = arith.constant 0 : i32
    %0 = arith.cmpi eq, %arg2, %c0_i32 : i32
    %1 = arith.extui %0 : i1 to i32
    %c0_i32_0 = arith.constant 0 : i32
    %2 = arith.cmpi ne, %1, %c0_i32_0 : i32
    scf.if %2 {
      %cst_14 = arith.constant 0.000000e+00 : f32
      %21 = vector.broadcast %cst_14 : f32 to vector<8x1xf32>
      %c0_15 = arith.constant 0 : index
      %c0_16 = arith.constant 0 : index
      %22 = vector.load %arg5[%c0_15, %c0_16] : memref<8x1xf32, #tpu.memory_space<vmem>>, vector<8x1xf32>
      tpu.vector_store %arg5[%c0_15, %c0_16], %21 {strides = array<i32>} : memref<8x1xf32, #tpu.memory_space<vmem>>, vector<8x1xf32>,
      %cst_17 = arith.constant 0.000000e+00 : f32
      %23 = vector.broadcast %cst_17 : f32 to vector<8x1xf32>
      %c0_18 = arith.constant 0 : index
      %c0_19 = arith.constant 0 : index
      %24 = vector.load %arg6[%c0_18, %c0_19] : memref<8x1xf32, #tpu.memory_space<vmem>>, vector<8x1xf32>
      tpu.vector_store %arg6[%c0_18, %c0_19], %23 {strides = array<i32>} : memref<8x1xf32, #tpu.memory_space<vmem>>, vector<8x1xf32>,
    } else {
    }
    %c0 = arith.constant 0 : index
    %c0_1 = arith.constant 0 : index
    %3 = vector.load %arg3[%c0, %c0_1] : memref<8x256xf32, #tpu.memory_space<vmem>>, vector<8x256xf32>
    %c0_2 = arith.constant 0 : index
    %c0_3 = arith.constant 0 : index
    %4 = vector.load %arg4[%c0_2, %c0_3] : memref<8x256xf32, #tpu.memory_space<vmem>>, vector<8x256xf32>
    %5 = arith.mulf %3, %4 : vector<8x256xf32>
    %cst = arith.constant dense<0.000000e+00> : vector<8xf32>
    %6 = vector.multi_reduction <add>, %5, %cst [1] : vector<8x256xf32> to vector<8xf32>
    %7 = vector.shape_cast %6 : vector<8xf32> to vector<8x1xf32>
    %8 = arith.mulf %3, %3 : vector<8x256xf32>
    %cst_4 = arith.constant dense<0.000000e+00> : vector<8xf32>
    %9 = vector.multi_reduction <add>, %8, %cst_4 [1] : vector<8x256xf32> to vector<8xf32>
    %10 = vector.shape_cast %9 : vector<8xf32> to vector<8x1xf32>
    %11 = arith.mulf %4, %4 : vector<8x256xf32>
    %cst_5 = arith.constant dense<0.000000e+00> : vector<8xf32>
    %12 = vector.multi_reduction <add>, %11, %cst_5 [1] : vector<8x256xf32> to vector<8xf32>
    %13 = vector.shape_cast %12 : vector<8xf32> to vector<8x1xf32>
    %14 = arith.addf %10, %13 : vector<8x1xf32>
    %c0_6 = arith.constant 0 : index
    %c0_7 = arith.constant 0 : index
    %15 = vector.load %arg5[%c0_6, %c0_7] : memref<8x1xf32, #tpu.memory_space<vmem>>, vector<8x1xf32>
    %16 = arith.addf %15, %7 : vector<8x1xf32>
    %c0_8 = arith.constant 0 : index
    %c0_9 = arith.constant 0 : index
    %17 = vector.load %arg5[%c0_8, %c0_9] : memref<8x1xf32, #tpu.memory_space<vmem>>, vector<8x1xf32>
    tpu.vector_store %arg5[%c0_8, %c0_9], %16 {strides = array<i32>} : memref<8x1xf32, #tpu.memory_space<vmem>>, vector<8x1xf32>,
    %c0_10 = arith.constant 0 : index
    %c0_11 = arith.constant 0 : index
    %18 = vector.load %arg6[%c0_10, %c0_11] : memref<8x1xf32, #tpu.memory_space<vmem>>, vector<8x1xf32>
    %19 = arith.addf %18, %14 : vector<8x1xf32>
    %c0_12 = arith.constant 0 : index
    %c0_13 = arith.constant 0 : index
    %20 = vector.load %arg6[%c0_12, %c0_13] : memref<8x1xf32, #tpu.memory_space<vmem>>, vector<8x1xf32>
    tpu.vector_store %arg6[%c0_12, %c0_13], %19 {strides = array<i32>} : memref<8x1xf32, #tpu.memory_space<vmem>>, vector<8x1xf32>,
    return
  }
  func.func @transform_0(%arg0: i32, %arg1: i32, %arg2: i32) -> (i32, i32) {
    %c1_i32 = arith.constant 1 : i32
    %0 = arith.muli %arg0, %c1_i32 : i32
    %1 = arith.addi %0, %arg2 : i32
    %c0_i32 = arith.constant 0 : i32
    %2 = arith.minsi %1, %c0_i32 : i32
    %c0_i32_0 = arith.constant 0 : i32
    return %arg1, %2 : i32, i32
  }
  func.func @transform_1(%arg0: i32, %arg1: i32, %arg2: i32) -> (i32, i32) {
    %c1_i32 = arith.constant 1 : i32
    %0 = arith.muli %arg0, %c1_i32 : i32
    %1 = arith.addi %0, %arg2 : i32
    %c0_i32 = arith.constant 0 : i32
    %2 = arith.minsi %1, %c0_i32 : i32
    %c0_i32_0 = arith.constant 0 : i32
    return %arg1, %2 : i32, i32
  }
  func.func @transform_2(%arg0: i32, %arg1: i32, %arg2: i32) -> (i32, i32) {
    %c1_i32 = arith.constant 1 : i32
    %0 = arith.muli %arg0, %c1_i32 : i32
    %1 = arith.addi %0, %arg1 : i32
    %c0_i32 = arith.constant 0 : i32
    %c0_i32_0 = arith.constant 0 : i32
    return %1, %c0_i32 : i32, i32
  }
  func.func @transform_3(%arg0: i32, %arg1: i32, %arg2: i32) -> (i32, i32) {
    %c1_i32 = arith.constant 1 : i32
    %0 = arith.muli %arg0, %c1_i32 : i32
    %1 = arith.addi %0, %arg1 : i32
    %c0_i32 = arith.constant 0 : i32
    %c0_i32_0 = arith.constant 0 : i32
    return %1, %c0_i32 : i32, i32
  }
}

</mosaic_0001>

<bundles_post_ra>
// kernel: tpu_custom_call.1
= control target key start
LH: loop header
LB: loop body
LE: loop exit
PB: predicated region body
PF: predicated region fallthrough
CT: control target
= control target key end

     0   :  { %9 = vsyncpa [#allocation3], 0  ;;  %s271_s0 = inlined_call_operand.hbm [shape: f32[8,256], index: 0, kind: input, shape index: {}]   ;;  %s272_s1 = inlined_call_operand.hbm [shape: f32[8,256], index: 1, kind: input, shape index: {}]   ;;  %s273_s2 = inlined_call_operand.vmem [shape: f32[8,1], index: 2, kind: output, shape index: {0}]   ;;  %s274_s3 = inlined_call_operand.vmem [shape: f32[8,1], index: 3, kind: output, shape index: {1}]  }
   0x1   :  { %s22_s14 = sshll.u32 %s271_s0, 4  ;;  %s23_s14 = int_to_ptr.hbm [resolvable:$true] %s22_s14 }
   0x2   :  { %10 = vsyncpa [#allocation5], 0  ;;  %s224_s15 = smov [#allocation2]   ;;  %s39_s19 = sshll.u32 %s272_s1, 4  ;;  %s40_s19 = int_to_ptr.hbm [resolvable:$true] %s39_s19 }
   0x3   :  { %s24_s16 = sshll.u32 %s224_s15, 4  ;;  %s225_s20 = smov [#allocation4]   ;;  %s25_s16 = int_to_ptr.vmem [resolvable:$true] %s24_s16 }
   0x4   :  { %27 = dma.hbm_to_vmem [thread:$0]  %s23_s14, 256, %s25_s16, [#allocation3]  }
   0x5   :  { %s41_s21 = sshll.u32 %s225_s20, 4  ;;  %s42_s21 = int_to_ptr.vmem [resolvable:$true] %s41_s21 }
   0x6   :  { %44 = dma.hbm_to_vmem [thread:$0]  %s40_s19, 256, %s42_s21, [#allocation5]  }
   0x7   :  { %220 = dma.done.wait [#allocation3], 256  }
   0x8   :  { %221 = vsyncadd [#allocation3], 4294967040 }
   0x9   :  { %222 = dma.done.wait [#allocation5], 256  }
   0xa   :  { %223 = vsyncadd [#allocation5], 4294967040  ;;  %v90_v0 = vld [vmem:[#allocation2] sm:$0xff]  ;;  %v91_v1 = vld [vmem:[#allocation2 + $0x8] sm:$0xff]  ;;  %vm87_vm0 = vcmask 7168   ;;  %v226_v13 = vmov 0.0  }
   0xb   :  { %v92_v2 = vld [vmem:[#allocation4] sm:$0xff]  ;;  %v99_v3 = vmul.f32 %v90_v0, %v90_v0  ;;  %v100_v4 = vmul.f32 %v91_v1, %v91_v1  ;;  %v93_v5 = vld [vmem:[#allocation4 + $0x8] sm:$0xff]  ;;  %89 = vst.msk [vmem:[%s274_s3] sm:$0xff] %vm87_vm0, %v226_v13 }
   0xc   :  { %v94_v6 = vmul.f32 %v92_v2, %v90_v0  ;;  %v95_v7 = vmul.f32 %v93_v5, %v91_v1  ;;  %v104_v10 = vmul.f32 %v92_v2, %v92_v2  ;;  %v105_v11 = vmul.f32 %v93_v5, %v93_v5  ;;  %88 = vst.msk [vmem:[%s273_s2] sm:$0xff] %vm87_vm0, %v226_v13 }
   0xd   :  { %v101_v8 = vadd.f32 %v100_v4, %v99_v3 }
   0xe   :  { %v96_v9 = vadd.f32 %v95_v7, %v94_v6  ;;  %v106_v12 = vadd.f32 %v105_v11, %v104_v10 }
   0xf   :  { %102 = vadd.xlane.f32.xlu0 %v101_v8 }
  0x10   :  { %97 = vadd.xlane.f32.xlu1 %v96_v9 }
  0x12   :  { %v114_v19 = vld [vmem:[%s274_s3] sm:$0xff] }
  0x13   :  { %v110_v14 = vld [vmem:[%s273_s2] sm:$0xff] }
  0x17   :  { %107 = vadd.xlane.f32.xlu0 %v106_v12 }
  0x82   :  { %v103_v15 = vpop.xlane.xlu0 %102 }
  0x83   :  { %v98_v16 = vpop.xlane.xlu1 %97 }
  0x84   :  { %v111_v17 = vadd.f32 %v110_v14, %v98_v16 }
  0x86   :  { %113 = vst.msk [vmem:[%s273_s2] sm:$0xff] %vm87_vm0, %v111_v17 }
  0x8a   :  { %v108_v18 = vpop.xlane.xlu0 %107 }
  0x8b   :  { %v109_v20 = vadd.f32 %v108_v18, %v103_v15 }
  0x8d   :  { %v115_v21 = vadd.f32 %v114_v19, %v109_v20 }
  0x8f   :  { %116 = vst.msk [vmem:[%s274_s3] sm:$0xff] %vm87_vm0, %v115_v21 }
  0x90   :  { %147 = vsyncpa [#allocation3], 1 }
  0x91   :  { %148 = vsyncpa [#allocation5], 1 }

</bundles_post_ra>
